<compile_context>
chip_gen: v6e
topology: v6e:2x2x1
jax: 0.10.0
libtpu: 0.0.40
codegen_flags: <defaults>
</compile_context>

<pallas_src>
import functools

import jax
import jax.numpy as jnp
from jax.experimental import pallas as pl
from jax.experimental.pallas import tpu as pltpu

_LANE = 128
_SUPPORTED = ("relu", "tanh", "linear", "sigmoid")


# --------------------------------------------------------------------------- #
# Kernel body
# --------------------------------------------------------------------------- #
def _activation_kernel(x_ref, o_ref, *, activation: str, compute_dtype):
    if activation == "relu":
        # Preserves input dtype (incl. integers), matching torch.relu.
        o_ref[...] = jnp.maximum(x_ref[...], 0)
    elif activation == "tanh":
        x = x_ref[...].astype(compute_dtype)  # int->f32 promotion happens here
        o_ref[...] = jnp.tanh(x).astype(o_ref.dtype)
    elif activation == "sigmoid":
        x = x_ref[...].astype(compute_dtype)
        # sigmoid(x) == 0.5 * tanh(0.5*x) + 0.5 : a single EUP op + one VPU FMA.
        o_ref[...] = (0.5 * jnp.tanh(0.5 * x) + 0.5).astype(o_ref.dtype)
    else:  # "linear" — short-circuited in the wrapper; kept for completeness.
        o_ref[...] = x_ref[...]


# --------------------------------------------------------------------------- #
# Tiling / layout planning (all trace-time Python)
# --------------------------------------------------------------------------- #
def _align_up(v: int, m: int) -> int:
    return -(-v // m) * m


def _pick_cols(n: int):
    """Largest lane-dense column count that divides n exactly (no padding)."""
    for cols in (1024, 512, 256, 128):
        if n % cols == 0:
            return cols
    return None


def _device_supports_bf16_eup() -> bool:
    """v6e and v7x have bf16-capable VPU/EUP; v5e and older do not."""
    try:
        kind = jax.devices()[0].device_kind.lower()
    except Exception:
        return False
    return not any(tag in kind for tag in ("v2", "v3", "v4", "v5"))


def _vmem_budgets():
    """(vmem_limit_bytes, per-tile byte budget) for the current generation."""
    try:
        vmem_phys = pltpu.get_tpu_info().vmem_capacity_bytes
    except Exception:
        vmem_phys = 64 * 1024 * 1024  # conservative: v7x per-TC
    if vmem_phys <= 64 * 1024 * 1024:          # v7x-class: 64 MiB / TC
        return 32 * 1024 * 1024, 4 * 1024 * 1024
    return 64 * 1024 * 1024, 8 * 1024 * 1024   # v5e / v6e: 128 MiB


def _plan_rows_tiling(rows: int, cols: int, in_item: int, out_item: int):
    """Pick (tile_rows, grid, vmem_limit) for a (rows, cols) lane-dense slab."""
    vmem_limit, tile_budget = _vmem_budgets()
    max_item = max(in_item, out_item)
    # Sublane packing: 8 rows for 32-bit, 16 for bf16, 32 for int8.
    align = max(8, 32 // in_item)
    max_tile_rows = max(align, (tile_budget // (cols * max_item)) // align * align)

    if rows <= align:
        tile_rows = rows                       # full-extent block (always legal)
    else:
        tile_rows = min(max_tile_rows, _align_up(rows, align))
        if pl.cdiv(rows, tile_rows) == 1:
            # Enough data for 2 blocks: give v7x's second TensorCore work.
            tile_rows = _align_up(pl.cdiv(rows, 2), align)
        # Prefer an even block count so the 'parallel' axis splits evenly
        # across v7x's two TensorCores (no effect on v5e/v6e correctness).
        t = tile_rows
        while pl.cdiv(rows, t) % 2 == 1 and t > align:
            t -= align
        if pl.cdiv(rows, t) % 2 == 0:
            tile_rows = t

    grid = pl.cdiv(rows, tile_rows)
    # Explicit VMEM headroom check: 2 input + 2 output double buffers.
    buf_bytes = 2 * tile_rows * cols * (in_item + out_item)
    assert buf_bytes <= (3 * vmem_limit) // 4, (
        f"double-buffered tiles ({buf_bytes} B) exceed 75% of the VMEM "
        f"limit ({vmem_limit} B)"
    )
    return tile_rows, grid, vmem_limit


# --------------------------------------------------------------------------- #
# Fallback (tiny or ragged sizes): XLA fused elementwise = 2 HBM passes,
# already at the roofline; any pad/slice around a Pallas call would add passes.
# --------------------------------------------------------------------------- #
def _jnp_activation(x: jax.Array, activation: str) -> jax.Array:
    if activation == "relu":
        return jnp.maximum(x, 0)
    xf = x if jnp.issubdtype(x.dtype, jnp.floating) else x.astype(jnp.float32)
    if activation == "tanh":
        return jnp.tanh(xf)
    return jax.nn.sigmoid(xf)


# --------------------------------------------------------------------------- #
# Public wrapper — forward pass of CustomActivation
# --------------------------------------------------------------------------- #
def custom_activation(x: jax.Array, activation: str) -> jax.Array:
    """Apply `activation` elementwise to x (any shape/dtype)."""
    if activation not in _SUPPORTED:
        raise ValueError(
            "Unknown activation function! Supported activations are "
            "relu, tanh, linear and sigmoid"
        )

    # Linear is the identity: no HBM round trip.
    if activation == "linear":
        return x

    n = x.size
    if n == 0:
        return x

    floating = jnp.issubdtype(x.dtype, jnp.floating)
    if activation == "relu":
        out_dtype = x.dtype
    else:
        # torch promotion: tanh/sigmoid of integer tensors return float32.
        out_dtype = x.dtype if floating else jnp.float32

    cols = _pick_cols(n)
    # Tiny tensors (< one (8,128) vreg slab) or ragged sizes: fused XLA path.
    # (Cutoff kept low so realistic inputs exercise the Pallas kernel.)
    if cols is None or n < 8 * _LANE:
        return _jnp_activation(x, activation)

    # Compute dtype for transcendental branches.
    if activation == "relu":
        compute_dtype = x.dtype
    elif x.dtype == jnp.bfloat16 and _device_supports_bf16_eup():
        compute_dtype = jnp.bfloat16      # native bf16 EUP on v6e / v7x
    else:
        compute_dtype = jnp.float32       # v5e (no bf16 EUP) / ints / f32

    rows = n // cols
    x2d = x.reshape(rows, cols)           # free: contiguous bitcast, no copy

    in_item = jnp.dtype(x.dtype).itemsize
    out_item = jnp.dtype(out_dtype).itemsize
    tile_rows, grid, vmem_limit = _plan_rows_tiling(rows, cols, in_item, out_item)

    out2d = pl.pallas_call(
        functools.partial(
            _activation_kernel, activation=activation, compute_dtype=compute_dtype
        ),
        out_shape=jax.ShapeDtypeStruct((rows, cols), out_dtype),
        grid_spec=pltpu.PrefetchScalarGridSpec(
            num_scalar_prefetch=0,
            grid=(grid,),
            in_specs=[pl.BlockSpec((tile_rows, cols), lambda i: (i, 0))],
            out_specs=pl.BlockSpec((tile_rows, cols), lambda i: (i, 0)),
        ),
        compiler_params=pltpu.CompilerParams(
            dimension_semantics=("parallel",),
            vmem_limit_bytes=vmem_limit,
        ),
    )(x2d)

    return out2d.reshape(x.shape)


# --------------------------------------------------------------------------- #
# Demo / self-check
# --------------------------------------------------------------------------- #
if __name__ == "__main__":
    key = jax.random.PRNGKey(0)
    k1, k2, k3 = jax.random.split(key, 3)

    checks = []

    # NCHW conv-activation-like input: batch=2, channels=4, 16x16 spatial.
    x = jax.random.normal(k1, (2, 4, 16, 16), dtype=jnp.float32)
    refs = {
        "relu": jnp.maximum(x, 0.0),
        "tanh": jnp.tanh(x),
        "linear": x,
        "sigmoid": jax.nn.sigmoid(x),
    }
    for act, ref in refs.items():
        out = jax.block_until_ready(custom_activation(x, act))
        checks.append(out.shape == x.shape and out.dtype == x.dtype)
        checks.append(bool(jnp.allclose(out, ref, atol=1e-5, rtol=1e-5)))

    # Larger lane-aligned input -> multi-block (even) grid through the kernel.
    y = jax.random.normal(k2, (8, 4, 32, 32), dtype=jnp.float32)
    out_y = jax.block_until_ready(custom_activation(y, "tanh"))
    checks.append(bool(jnp.allclose(out_y, jnp.tanh(y), atol=1e-5, rtol=1e-5)))

    # Ragged size (flat length not a multiple of 128) -> fused-XLA fallback path.
    z = jax.random.normal(k3, (3, 5, 17, 19), dtype=jnp.float32)
    out_z = jax.block_until_ready(custom_activation(z, "sigmoid"))
    checks.append(bool(jnp.allclose(out_z, jax.nn.sigmoid(z), atol=1e-5, rtol=1e-5)))

    # Integer input: tanh/sigmoid promote to float32 inside the kernel
    # (torch semantics); relu keeps the integer dtype.
    w = jax.random.randint(k1, (8, 256), -3, 4, dtype=jnp.int32)
    out_w = jax.block_until_ready(custom_activation(w, "sigmoid"))
    checks.append(out_w.dtype == jnp.float32)
    checks.append(
        bool(jnp.allclose(out_w, jax.nn.sigmoid(w.astype(jnp.float32)),
                          atol=1e-5, rtol=1e-5))
    )
    out_wr = jax.block_until_ready(custom_activation(w, "relu"))
    checks.append(out_wr.dtype == jnp.int32)
    checks.append(bool(jnp.array_equal(out_wr, jnp.maximum(w, 0))))

    if all(checks):
        print("KERNEL_OK")
</pallas_src>

<mosaic_0001>
module attributes {stable_mosaic.version = 11 : i64} {
  func.func @_activation_kernel(%arg0: i32, %arg1: memref<2x1024xf32, #tpu.memory_space<vmem>>, %arg2: memref<2x1024xf32, #tpu.memory_space<vmem>>) attributes {dimension_semantics = [#tpu.dimension_semantics<parallel>], iteration_bounds = array<i64: 1>, scalar_prefetch = 0 : i64, scratch_operands = 0 : i64, tpu.core_type = #tpu.core_type<tc>, window_params = [{transform_indices = @transform_0, window_bounds = array<i64: 2, 1024>}, {transform_indices = @transform_1, window_bounds = array<i64: 2, 1024>}]} {
    %c0 = arith.constant 0 : index
    %c0_0 = arith.constant 0 : index
    %0 = vector.load %arg1[%c0, %c0_0] : memref<2x1024xf32, #tpu.memory_space<vmem>>, vector<2x1024xf32>
    %cst = arith.constant 0.000000e+00 : f32
    %1 = vector.broadcast %cst : f32 to vector<2x1024xf32>
    %2 = arith.maximumf %0, %1 : vector<2x1024xf32>
    %c0_1 = arith.constant 0 : index
    %c0_2 = arith.constant 0 : index
    %3 = vector.load %arg2[%c0_1, %c0_2] : memref<2x1024xf32, #tpu.memory_space<vmem>>, vector<2x1024xf32>
    tpu.vector_store %arg2[%c0_1, %c0_2], %2 {strides = array<i32>} : memref<2x1024xf32, #tpu.memory_space<vmem>>, vector<2x1024xf32>,
    return
  }
  func.func @transform_0(%arg0: i32) -> (i32, i32) {
    %c0_i32 = arith.constant 0 : i32
    %c0_i32_0 = arith.constant 0 : i32
    return %arg0, %c0_i32 : i32, i32
  }
  func.func @transform_1(%arg0: i32) -> (i32, i32) {
    %c0_i32 = arith.constant 0 : i32
    %c0_i32_0 = arith.constant 0 : i32
    return %arg0, %c0_i32 : i32, i32
  }
}

</mosaic_0001>

<bundles_post_ra>
// kernel: tpu_custom_call.1
= control target key start
LH: loop header
LB: loop body
LE: loop exit
PB: predicated region body
PF: predicated region fallthrough
CT: control target
= control target key end

     0   :  { %6 = vsyncpa [#allocation3], 0  ;;  %s106_s0 = inlined_call_operand.hbm [shape: f32[2,1024], index: 0, kind: input, shape index: {}]   ;;  %s107_s1 = inlined_call_operand.hbm [shape: f32[2,1024], index: 1, kind: output, shape index: {}]  }
   0x1   :  { %7 = vsyncpa [#allocation4], 0  ;;  %s88_s6 = smov [#allocation2]  }
   0x2   :  { %s14_s7 = sshll.u32 %s88_s6, 4  ;;  %s15_s7 = int_to_ptr.vmem [resolvable:$true] %s14_s7 }
   0x3   :  { %s52_s8 = scalar_lea.vmem %s15_s7, 256  ;;  %p57_p1 = scmp.lt.s32.totalorder %s15_s7, %s15_s7 }
   0x4   :  { %p53_p0 = scmp.ne.s32.totalorder %s15_s7, %s52_s8  ;;  %p58_p2 = scmp.lt.s32.totalorder %s52_s8, %s52_s8 }
   0x6   :  { %p59_p3 = por %p58_p2, %p57_p1 }
   0x8   :  { %p60_p4 = pnand %p59_p3, %p53_p0 }
   0xa   :  { %63 = shalt.err (!%p60_p4)
}
   0xb   :  { %17 = dma.hbm_to_vmem [thread:$0]  %s106_s0, 256, %s15_s7, [#allocation3]  }
   0xc   :  { %84 = dma.done.wait [#allocation3], 256  }
   0xd   :  { %85 = vsyncadd [#allocation3], 4294967040  ;;  %s89_s11 = smov [#allocation5]   ;;  %v21_v0 = vld [vmem:[#allocation2] sm:$0xff]  ;;  %v22_v1 = vld [vmem:[#allocation2 + $0x8] sm:$0xff] }
   0xe   :  { %s33_s12 = sshll.u32 %s89_s11, 4  ;;  %v23_v2 = vmax.f32 %v21_v0, 0.0  ;;  %v24_v3 = vmax.f32 %v22_v1, 0.0  ;;  %s34_s12 = int_to_ptr.vmem [resolvable:$true] %s33_s12 }
   0xf   :  { %s64_s13 = scalar_lea.vmem %s34_s12, 256  ;;  %p69_p6 = scmp.lt.s32.totalorder %s34_s12, %s34_s12 }
  0x10   :  { %25 = vst [vmem:[#allocation5] sm:$0xff] %v23_v2  ;;  %26 = vst [vmem:[#allocation5 + $0x8] sm:$0xff] %v24_v3  ;;  %p65_p5 = scmp.ne.s32.totalorder %s34_s12, %s64_s13  ;;  %p70_p7 = scmp.lt.s32.totalorder %s64_s13, %s64_s13 }
  0x12   :  { %p71_p8 = por %p70_p7, %p69_p6 }
  0x14   :  { %p72_p9 = pnand %p71_p8, %p65_p5 }
  0x16   :  { %75 = shalt.err (!%p72_p9)
}
  0x17   :  { %36 = dma.vmem_to_hbm [thread:$0]  %s34_s12, 256, %s107_s1, [#allocation4]  }
  0x18   :  { %86 = dma.done.wait [#allocation4], 256  }
  0x19   :  { %87 = vsyncadd [#allocation4], 4294967040 }
  0x1a   :  { %40 = vsyncpa [#allocation3], 1 }
  0x1b   :  { %41 = vsyncpa [#allocation4], 1 }

</bundles_post_ra>
